<compile_context>
chip_gen: v7x
topology: tpu7x:2x2x1
jax: 0.10.0
libtpu: 0.0.40
codegen_flags: <defaults>
</compile_context>

<pallas_src>
import functools

import jax
import jax.numpy as jnp
from jax.experimental import pallas as pl
from jax.experimental.pallas import tpu as pltpu

LANE = 128  # TPU lane width; padding/tiling unit (MXU-friendly on all chips)


def _round_up(x, m):
    return (x + m - 1) // m * m


def _pad2d(a, rows, cols):
    out = jnp.zeros((rows, cols), a.dtype)
    return out.at[: a.shape[0], : a.shape[1]].set(a)


# ---------------------------------------------------------------------------
# Fused N-layer GCN kernel.
#   For each layer l:   acc = Ahat @ (Z_l @ W_l);  Z_{l+1} = relu(acc + b_l)
#   Last layer:         out = acc + b_L
# grid = (layer, k): `layer` iterates layers, `k` tiles the adjacency column
# (reduction) axis.  Ahat streams in (N_pad, TK) bf16 slabs; X, the current
# layer's W/b, the bf16 transform scratch and the f32 accumulator are
# VMEM-resident.
# ---------------------------------------------------------------------------
def _fused_gcn_kernel(adj_ref, x_ref, w_ref, b_ref, o_ref, zw_ref, acc_ref, *, tk):
    layer = pl.program_id(0)
    n_layers = pl.num_programs(0)
    k = pl.program_id(1)
    k_last = pl.num_programs(1) - 1

    # Start of first layer: feature transform of the raw node features.
    @pl.when(jnp.logical_and(layer == 0, k == 0))
    def _():
        zw_ref[...] = jnp.dot(
            x_ref[...], w_ref[...], preferred_element_type=jnp.float32
        ).astype(jnp.bfloat16)

    # Start of later layers: transform the previous post-ReLU activation
    # (left in zw_ref at the end of the previous layer) with this layer's W.
    @pl.when(jnp.logical_and(layer > 0, k == 0))
    def _():
        zw_ref[...] = jnp.dot(
            zw_ref[...], w_ref[...], preferred_element_type=jnp.float32
        ).astype(jnp.bfloat16)

    # Reset the f32 aggregation accumulator at the start of every layer.
    @pl.when(k == 0)
    def _():
        acc_ref[...] = jnp.zeros_like(acc_ref)

    # Partial aggregation on the MXU: acc += Ahat[:, kblk] @ (Z W)[kblk, :]
    off = pl.multiple_of(k * tk, tk)
    acc_ref[...] += jnp.dot(
        adj_ref[...], zw_ref[pl.ds(off, tk), :],
        preferred_element_type=jnp.float32)

    # End of a hidden layer: bias + ReLU in f32 (dropout p=0.0 / eval ->
    # identity); keep activation in VMEM scratch (bf16) for the next layer.
    @pl.when(jnp.logical_and(layer < n_layers - 1, k == k_last))
    def _():
        zw_ref[...] = jnp.maximum(acc_ref[...] + b_ref[...], 0.0).astype(jnp.bfloat16)

    # End of the last layer: bias add + lane-dense (128-multiple) f32 store.
    @pl.when(jnp.logical_and(layer == n_layers - 1, k == k_last))
    def _():
        o_ref[...] = acc_ref[...] + b_ref[...]


def fused_gcn(adj_pad, x_pad, w_stack, b_stack, *, tk):
    n_pad, c = x_pad.shape
    num_layers = int(w_stack.shape[0])
    k_tiles = n_pad // tk

    flops = 2 * num_layers * (n_pad * c * c + n_pad * n_pad * c)
    bytes_accessed = (
        num_layers * adj_pad.size * adj_pad.dtype.itemsize   # Ahat streamed per layer
        + x_pad.size * x_pad.dtype.itemsize
        + w_stack.size * w_stack.dtype.itemsize
        + b_stack.size * b_stack.dtype.itemsize
        + n_pad * c * 4)                                      # f32 output

    kernel = functools.partial(_fused_gcn_kernel, tk=tk)
    return pl.pallas_call(
        kernel,
        out_shape=jax.ShapeDtypeStruct((n_pad, c), jnp.float32),
        grid_spec=pltpu.PrefetchScalarGridSpec(
            num_scalar_prefetch=0,
            grid=(num_layers, k_tiles),
            in_specs=[
                pl.BlockSpec((n_pad, tk), lambda l, k: (0, k)),      # Ahat slab (bf16)
                pl.BlockSpec((n_pad, c), lambda l, k: (0, 0)),       # X (resident)
                pl.BlockSpec((None, c, c), lambda l, k: (l, 0, 0)),  # W of current layer
                pl.BlockSpec((None, 1, c), lambda l, k: (l, 0, 0)),  # b of current layer
            ],
            out_specs=pl.BlockSpec((n_pad, c), lambda l, k: (0, 0)),
            scratch_shapes=[
                pltpu.VMEM((n_pad, c), jnp.bfloat16),  # Z@W / activation scratch
                pltpu.VMEM((n_pad, c), jnp.float32),   # f32 aggregation accumulator
            ],
        ),
        compiler_params=pltpu.CompilerParams(
            dimension_semantics=("arbitrary", "arbitrary")),
        cost_estimate=pl.CostEstimate(
            flops=flops, transcendentals=0, bytes_accessed=bytes_accessed),
    )(adj_pad, x_pad, w_stack, b_stack)


# ---------------------------------------------------------------------------
# Glue: GCN normalization  Ahat = D^-1/2 (A + I) D^-1/2   (plain JAX).
# Scatter-ADD (not set) so duplicated edges contribute to both messages and
# degree, matching PyG GCNConv.  Build once and cache across forward calls.
# ---------------------------------------------------------------------------
def gcn_norm_adj(edge_index, num_nodes):
    src, dst = edge_index[0], edge_index[1]
    a = jnp.zeros((num_nodes, num_nodes), jnp.float32)
    a = a.at[dst, src].add(1.0)                      # A[dst, src] += 1
    a = a + jnp.eye(num_nodes, dtype=jnp.float32)    # self loops
    deg = jnp.sum(a, axis=1)
    d = jnp.where(deg > 0.0, 1.0 / jnp.sqrt(deg), 0.0)
    return d[:, None] * a * d[None, :]


def build_adj_padded(edge_index, num_nodes, n_pad):
    """Padded bf16 normalized adjacency; compute once, reuse every forward."""
    adj = gcn_norm_adj(edge_index, num_nodes)
    return _pad2d(adj, n_pad, n_pad).astype(jnp.bfloat16)


# ---------------------------------------------------------------------------
# MyGCN forward (dropout = 0.0 / eval mode -> identity)
# ---------------------------------------------------------------------------
def my_gcn_forward(x, edge_index, params, adj_pad=None):
    n, f_in = x.shape
    f_out = params[-1][0].shape[1]
    dims = [f_in] + [w.shape[1] for (w, _) in params]

    c = _round_up(max(dims), LANE)   # common lane-dense feature width
    n_pad = _round_up(n, LANE)       # MXU/lane-aligned node dim
    # adjacency reduction tile: largest of these that cleanly divides n_pad
    tk = next(t for t in (1024, 512, 256, 128) if n_pad % t == 0)

    if adj_pad is None:
        adj_pad = build_adj_padded(edge_index, n, n_pad)

    x_pad = _pad2d(x, n_pad, c).astype(jnp.bfloat16)
    w_stack = jnp.stack([_pad2d(w, c, c).astype(jnp.bfloat16) for (w, _) in params])
    b_stack = jnp.stack([_pad2d(b.reshape(1, -1), 1, c) for (_, b) in params])

    out_pad = fused_gcn(adj_pad, x_pad, w_stack, b_stack, tk=tk)
    return out_pad[:n, :f_out]


def init_params(key, in_channels, out_channels, hidden=64, max_depth=2):
    """Deterministic Glorot-style init matching GCNConv parameter shapes."""
    dims = []
    for i in range(max_depth):
        if i == 0:
            dims.append((in_channels, hidden if max_depth > 1 else out_channels))
        elif i + 1 == max_depth:
            dims.append((hidden, out_channels))
        else:
            dims.append((hidden, hidden))
    params = []
    for fi, fo in dims:
        key, wk = jax.random.split(key)
        scale = jnp.sqrt(6.0 / (fi + fo))
        w = jax.random.uniform(wk, (fi, fo), jnp.float32, -scale, scale)
        b = jnp.zeros((fo,), jnp.float32)
        params.append((w, b))
    return params


if __name__ == "__main__":
    key = jax.random.PRNGKey(0)

    # small synthetic graph: 16 nodes, 8 input features, hidden=64, 4 classes
    num_nodes, in_channels, hidden, out_channels = 16, 8, 64, 4
    num_edges = 40

    kx, ke, kp = jax.random.split(key, 3)
    x = jax.random.normal(kx, (num_nodes, in_channels), jnp.float32)
    edge_index = jax.random.randint(ke, (2, num_edges), 0, num_nodes, jnp.int32)

    params = init_params(kp, in_channels, out_channels, hidden=hidden, max_depth=2)

    # Build (and in a real serving loop: cache) the normalized adjacency once.
    n_pad = _round_up(num_nodes, LANE)
    adj_pad = build_adj_padded(edge_index, num_nodes, n_pad)

    out = my_gcn_forward(x, edge_index, params, adj_pad=adj_pad)
    out = jax.block_until_ready(out)

    # pure-JAX f32 reference of the same math (kernel uses bf16 operands with
    # f32 accumulation -> loose-ish tolerance)
    adj = gcn_norm_adj(edge_index, num_nodes)
    ref = jnp.maximum(adj @ (x @ params[0][0]) + params[0][1], 0.0)
    ref = adj @ (ref @ params[1][0]) + params[1][1]
    assert out.shape == (num_nodes, out_channels)
    assert jnp.allclose(out, ref, atol=5e-2, rtol=5e-2)

    print("KERNEL_OK")
</pallas_src>

<mosaic_0001>
module attributes {stable_mosaic.version = 11 : i64} {
  func.func @_fused_gcn_kernel(%arg0: i32, %arg1: i32, %arg2: memref<128x128xbf16, #tpu.memory_space<vmem>>, %arg3: memref<128x128xbf16, #tpu.memory_space<vmem>>, %arg4: memref<1x128x128xbf16, #tpu.memory_space<vmem>>, %arg5: memref<1x1x128xf32, #tpu.memory_space<vmem>>, %arg6: memref<128x128xf32, #tpu.memory_space<vmem>>, %arg7: memref<128x128xbf16, #tpu.memory_space<vmem>>, %arg8: memref<128x128xf32, #tpu.memory_space<vmem>>) attributes {dimension_semantics = [#tpu.dimension_semantics<arbitrary>, #tpu.dimension_semantics<arbitrary>], iteration_bounds = array<i64: 2, 1>, scalar_prefetch = 0 : i64, scratch_operands = 2 : i64, tpu.core_type = #tpu.core_type<tc>, window_params = [{transform_indices = @transform_0, window_bounds = array<i64: 128, 128>}, {pipeline_mode = #tpu.pipeline_mode<synchronous>, transform_indices = @transform_1, window_bounds = array<i64: 128, 128>}, {transform_indices = @transform_2, window_bounds = array<i64: 1, 128, 128>}, {transform_indices = @transform_3, window_bounds = array<i64: 1, 1, 128>}, {pipeline_mode = #tpu.pipeline_mode<synchronous>, transform_indices = @transform_4, window_bounds = array<i64: 128, 128>}]} {
    %c0_i32 = arith.constant 0 : i32
    %0 = arith.cmpi eq, %arg0, %c0_i32 : i32
    %c0_i32_0 = arith.constant 0 : i32
    %1 = arith.cmpi eq, %arg1, %c0_i32_0 : i32
    %2 = arith.andi %0, %1 : i1
    %3 = arith.extui %2 : i1 to i32
    %c0_i32_1 = arith.constant 0 : i32
    %4 = arith.cmpi ne, %3, %c0_i32_1 : i32
    scf.if %4 {
      %c0_18 = arith.constant 0 : index
      %c0_19 = arith.constant 0 : index
      %32 = vector.load %arg3[%c0_18, %c0_19] : memref<128x128xbf16, #tpu.memory_space<vmem>>, vector<128x128xbf16>
      %c0_20 = arith.constant 0 : index
      %c0_21 = arith.constant 0 : index
      %c0_22 = arith.constant 0 : index
      %33 = vector.load %arg4[%c0_20, %c0_21, %c0_22] : memref<1x128x128xbf16, #tpu.memory_space<vmem>>, vector<1x128x128xbf16>
      %34 = vector.shape_cast %33 : vector<1x128x128xbf16> to vector<128x128xbf16>
      %cst_23 = arith.constant dense<0.000000e+00> : vector<128x128xf32>
      %35 = tpu.matmul %32, %34, %cst_23 {dimension_numbers = #tpu.dot_dimension_numbers<[1], [0], [0], [1], [0, 0, 1, 1], [], []>} : vector<128x128xbf16>, vector<128x128xbf16>, vector<128x128xf32> -> vector<128x128xf32>
      %36 = arith.truncf %35 : vector<128x128xf32> to vector<128x128xbf16>
      %c0_24 = arith.constant 0 : index
      %c0_25 = arith.constant 0 : index
      %37 = vector.load %arg7[%c0_24, %c0_25] : memref<128x128xbf16, #tpu.memory_space<vmem>>, vector<128x128xbf16>
      tpu.vector_store %arg7[%c0_24, %c0_25], %36 {strides = array<i32>} : memref<128x128xbf16, #tpu.memory_space<vmem>>, vector<128x128xbf16>,
    } else {
    }
    %c0_i32_2 = arith.constant 0 : i32
    %5 = arith.cmpi sgt, %arg0, %c0_i32_2 : i32
    %c0_i32_3 = arith.constant 0 : i32
    %6 = arith.cmpi eq, %arg1, %c0_i32_3 : i32
    %7 = arith.andi %5, %6 : i1
    %8 = arith.extui %7 : i1 to i32
    %c0_i32_4 = arith.constant 0 : i32
    %9 = arith.cmpi ne, %8, %c0_i32_4 : i32
    scf.if %9 {
      %c0_18 = arith.constant 0 : index
      %c0_19 = arith.constant 0 : index
      %32 = vector.load %arg7[%c0_18, %c0_19] : memref<128x128xbf16, #tpu.memory_space<vmem>>, vector<128x128xbf16>
      %c0_20 = arith.constant 0 : index
      %c0_21 = arith.constant 0 : index
      %c0_22 = arith.constant 0 : index
      %33 = vector.load %arg4[%c0_20, %c0_21, %c0_22] : memref<1x128x128xbf16, #tpu.memory_space<vmem>>, vector<1x128x128xbf16>
      %34 = vector.shape_cast %33 : vector<1x128x128xbf16> to vector<128x128xbf16>
      %cst_23 = arith.constant dense<0.000000e+00> : vector<128x128xf32>
      %35 = tpu.matmul %32, %34, %cst_23 {dimension_numbers = #tpu.dot_dimension_numbers<[1], [0], [0], [1], [0, 0, 1, 1], [], []>} : vector<128x128xbf16>, vector<128x128xbf16>, vector<128x128xf32> -> vector<128x128xf32>
      %36 = arith.truncf %35 : vector<128x128xf32> to vector<128x128xbf16>
      %c0_24 = arith.constant 0 : index
      %c0_25 = arith.constant 0 : index
      %37 = vector.load %arg7[%c0_24, %c0_25] : memref<128x128xbf16, #tpu.memory_space<vmem>>, vector<128x128xbf16>
      tpu.vector_store %arg7[%c0_24, %c0_25], %36 {strides = array<i32>} : memref<128x128xbf16, #tpu.memory_space<vmem>>, vector<128x128xbf16>,
    } else {
    }
    %c0_i32_5 = arith.constant 0 : i32
    %10 = arith.cmpi eq, %arg1, %c0_i32_5 : i32
    %11 = arith.extui %10 : i1 to i32
    %c0_i32_6 = arith.constant 0 : i32
    %12 = arith.cmpi ne, %11, %c0_i32_6 : i32
    scf.if %12 {
      %cst_18 = arith.constant 0.000000e+00 : f32
      %32 = vector.broadcast %cst_18 : f32 to vector<128x128xf32>
      %c0_19 = arith.constant 0 : index
      %c0_20 = arith.constant 0 : index
      %33 = vector.load %arg8[%c0_19, %c0_20] : memref<128x128xf32, #tpu.memory_space<vmem>>, vector<128x128xf32>
      tpu.vector_store %arg8[%c0_19, %c0_20], %32 {strides = array<i32>} : memref<128x128xf32, #tpu.memory_space<vmem>>, vector<128x128xf32>,
    } else {
    }
    %c128_i32 = arith.constant 128 : i32
    %13 = arith.muli %arg1, %c128_i32 : i32
    %14 = tpu.assume_multiple %13, 128 : i32
    %c0 = arith.constant 0 : index
    %c0_7 = arith.constant 0 : index
    %15 = vector.load %arg8[%c0, %c0_7] : memref<128x128xf32, #tpu.memory_space<vmem>>, vector<128x128xf32>
    %c0_8 = arith.constant 0 : index
    %c0_9 = arith.constant 0 : index
    %16 = vector.load %arg2[%c0_8, %c0_9] : memref<128x128xbf16, #tpu.memory_space<vmem>>, vector<128x128xbf16>
    %17 = arith.index_cast %14 : i32 to index
    %c0_10 = arith.constant 0 : index
    %18 = vector.load %arg7[%17, %c0_10] : memref<128x128xbf16, #tpu.memory_space<vmem>>, vector<128x128xbf16>
    %cst = arith.constant dense<0.000000e+00> : vector<128x128xf32>
    %19 = tpu.matmul %16, %18, %cst {dimension_numbers = #tpu.dot_dimension_numbers<[1], [0], [0], [1], [0, 0, 1, 1], [], []>} : vector<128x128xbf16>, vector<128x128xbf16>, vector<128x128xf32> -> vector<128x128xf32>
    %20 = arith.addf %15, %19 : vector<128x128xf32>
    %c0_11 = arith.constant 0 : index
    %c0_12 = arith.constant 0 : index
    %21 = vector.load %arg8[%c0_11, %c0_12] : memref<128x128xf32, #tpu.memory_space<vmem>>, vector<128x128xf32>
    tpu.vector_store %arg8[%c0_11, %c0_12], %20 {strides = array<i32>} : memref<128x128xf32, #tpu.memory_space<vmem>>, vector<128x128xf32>,
    %c1_i32 = arith.constant 1 : i32
    %22 = arith.cmpi slt, %arg0, %c1_i32 : i32
    %c0_i32_13 = arith.constant 0 : i32
    %23 = arith.cmpi eq, %arg1, %c0_i32_13 : i32
    %24 = arith.andi %22, %23 : i1
    %25 = arith.extui %24 : i1 to i32
    %c0_i32_14 = arith.constant 0 : i32
    %26 = arith.cmpi ne, %25, %c0_i32_14 : i32
    scf.if %26 {
      %c0_18 = arith.constant 0 : index
      %c0_19 = arith.constant 0 : index
      %32 = vector.load %arg8[%c0_18, %c0_19] : memref<128x128xf32, #tpu.memory_space<vmem>>, vector<128x128xf32>
      %c0_20 = arith.constant 0 : index
      %c0_21 = arith.constant 0 : index
      %c0_22 = arith.constant 0 : index
      %33 = vector.load %arg5[%c0_20, %c0_21, %c0_22] : memref<1x1x128xf32, #tpu.memory_space<vmem>>, vector<1x1x128xf32>
      %34 = vector.shape_cast %33 : vector<1x1x128xf32> to vector<1x128xf32>
      %35 = vector.broadcast %34 : vector<1x128xf32> to vector<128x128xf32>
      %36 = arith.addf %32, %35 : vector<128x128xf32>
      %cst_23 = arith.constant 0.000000e+00 : f32
      %37 = vector.broadcast %cst_23 : f32 to vector<128x128xf32>
      %38 = arith.maximumf %36, %37 : vector<128x128xf32>
      %39 = arith.truncf %38 : vector<128x128xf32> to vector<128x128xbf16>
      %c0_24 = arith.constant 0 : index
      %c0_25 = arith.constant 0 : index
      %40 = vector.load %arg7[%c0_24, %c0_25] : memref<128x128xbf16, #tpu.memory_space<vmem>>, vector<128x128xbf16>
      tpu.vector_store %arg7[%c0_24, %c0_25], %39 {strides = array<i32>} : memref<128x128xbf16, #tpu.memory_space<vmem>>, vector<128x128xbf16>,
    } else {
    }
    %c1_i32_15 = arith.constant 1 : i32
    %27 = arith.cmpi eq, %arg0, %c1_i32_15 : i32
    %c0_i32_16 = arith.constant 0 : i32
    %28 = arith.cmpi eq, %arg1, %c0_i32_16 : i32
    %29 = arith.andi %27, %28 : i1
    %30 = arith.extui %29 : i1 to i32
    %c0_i32_17 = arith.constant 0 : i32
    %31 = arith.cmpi ne, %30, %c0_i32_17 : i32
    scf.if %31 {
      %c0_18 = arith.constant 0 : index
      %c0_19 = arith.constant 0 : index
      %32 = vector.load %arg8[%c0_18, %c0_19] : memref<128x128xf32, #tpu.memory_space<vmem>>, vector<128x128xf32>
      %c0_20 = arith.constant 0 : index
      %c0_21 = arith.constant 0 : index
      %c0_22 = arith.constant 0 : index
      %33 = vector.load %arg5[%c0_20, %c0_21, %c0_22] : memref<1x1x128xf32, #tpu.memory_space<vmem>>, vector<1x1x128xf32>
      %34 = vector.shape_cast %33 : vector<1x1x128xf32> to vector<1x128xf32>
      %35 = vector.broadcast %34 : vector<1x128xf32> to vector<128x128xf32>
      %36 = arith.addf %32, %35 : vector<128x128xf32>
      %c0_23 = arith.constant 0 : index
      %c0_24 = arith.constant 0 : index
      %37 = vector.load %arg6[%c0_23, %c0_24] : memref<128x128xf32, #tpu.memory_space<vmem>>, vector<128x128xf32>
      tpu.vector_store %arg6[%c0_23, %c0_24], %36 {strides = array<i32>} : memref<128x128xf32, #tpu.memory_space<vmem>>, vector<128x128xf32>,
    } else {
    }
    return
  }
  func.func @transform_0(%arg0: i32, %arg1: i32) -> (i32, i32) {
    %c0_i32 = arith.constant 0 : i32
    %c0_i32_0 = arith.constant 0 : i32
    return %c0_i32, %arg1 : i32, i32
  }
  func.func @transform_1(%arg0: i32, %arg1: i32) -> (i32, i32) {
    %c0_i32 = arith.constant 0 : i32
    %c0_i32_0 = arith.constant 0 : i32
    %c0_i32_1 = arith.constant 0 : i32
    return %c0_i32, %c0_i32_0 : i32, i32
  }
  func.func @transform_2(%arg0: i32, %arg1: i32) -> (i32, i32, i32) {
    %c0_i32 = arith.constant 0 : i32
    %c0_i32_0 = arith.constant 0 : i32
    %c0_i32_1 = arith.constant 0 : i32
    return %arg0, %c0_i32, %c0_i32_0 : i32, i32, i32
  }
  func.func @transform_3(%arg0: i32, %arg1: i32) -> (i32, i32, i32) {
    %c0_i32 = arith.constant 0 : i32
    %c0_i32_0 = arith.constant 0 : i32
    %c0_i32_1 = arith.constant 0 : i32
    return %arg0, %c0_i32, %c0_i32_0 : i32, i32, i32
  }
  func.func @transform_4(%arg0: i32, %arg1: i32) -> (i32, i32) {
    %c0_i32 = arith.constant 0 : i32
    %c0_i32_0 = arith.constant 0 : i32
    %c0_i32_1 = arith.constant 0 : i32
    return %c0_i32, %c0_i32_0 : i32, i32
  }
}

</mosaic_0001>

<bundles_post_ra>
// kernel: tpu_custom_call.1
= control target key start
LH: loop header
LB: loop body
LE: loop exit
PB: predicated region body
PF: predicated region fallthrough
CT: control target
= control target key end

     0   :  { %9 = vsyncpa [#allocation5], 0  ;;  %s2009_s0 = inlined_call_operand.hbm [shape: bf16[128,128], index: 0, kind: input, shape index: {}]   ;;  %s2010_s1 = inlined_call_operand.hbm [shape: bf16[128,128], index: 1, kind: input, shape index: {}]   ;;  %s2011_s2 = inlined_call_operand.hbm [shape: bf16[2,128,128], index: 2, kind: input, shape index: {}]   ;;  %s2012_s3 = inlined_call_operand.vmem [shape: f32[2,1,128], index: 3, kind: input, shape index: {}]   ;;  %s2013_s4 = inlined_call_operand.hbm [shape: f32[128,128], index: 4, kind: output, shape index: {}]  }
   0x1   :  { %10 = vsyncpa [#allocation8], 0 }
   0x2   :  { %11 = vsyncpa [#allocation6], 0  ;;  %s1759_s15 = smov 0   ;;  %s1761_s16 = smov 0  }
   0x3   :  { %s1763_s17 = smov 0   ;;  %s1765_s18 = smov 0  }
   0x4   :  { %s1767_s19 = smov 0   ;;  %s1769_s20 = smov 0  }
   0x5 LB: > { %s1788_s21 = sadd.s32 4294967295, %s1724_s20   ;;  %p90_p0 = scmp.ne.s32.totalorder %s1712_s17, %s1708_s16  ;;  %s1724_s20 = sphi %s1769_s20, %s17_s20   ;;  %s1720_s19 = sphi %s1767_s19, %s2033_s19   ;;  %s1716_s18 = sphi %s1765_s18, %s2032_s18   ;;  %s1712_s17 = sphi %s1763_s17, %s2031_s17   ;;  %s1708_s16 = sphi %s1761_s16, %s2030_s16   ;;  %s1704_s15 = sphi %s1759_s15, %s2029_s15  }
   0x6   : > { %p91_p1 = scmp.eq.s32.totalorder %s1724_s20, 0  ;;  %p96_p2 = scmp.ne.s32.totalorder %s1708_s16, %s1704_s15 }
   0x7   : > { %p2014_p3 = scmp.eq.s32.totalorder %s1788_s21, 0  ;;  %p1180_p4 = scmp.ge.s32.totalorder %s1724_s20, 1 }
   0x8   : > { %p92_p5 = por %p91_p1, %p90_p0  ;;  %p154_p6 = scmp.lt.s32.totalorder %s1724_s20, 3 }
   0x9   : > { %p1799_p7 = por %p2014_p3, %p96_p2  ;;  %s1726_s24 = smov [#allocation4]  }
   0xa   : > { %p1803_p8 = pnand %p1180_p4, %p154_p6  ;;  %s168_s25 = sshll.u32 %s1726_s24, 4  ;;  %s169_s25 = int_to_ptr.vmem [resolvable:$true] %s168_s25 }
   0xb   : > { %s2018_s22 = scalar_select %p1799_p7, 1, 0 }
   0xc   : > { %s2019_s23 = scalar_select %p1803_p8, 1, 0 }
   0xd   : > { %p1444_p9 = pneg %p1803_p8  ;;  %p1457_p11 = scmp.lt.s32.totalorder %s1724_s20, 2 }
   0xe   : > { %s1550_s30 = scalar_lea.hbm %s2009_s0, 1024 }
   0xf   : > { %p1811_p10 = pnand %p1444_p9, %p2014_p3  ;;  %p1816_p12 = pnand %p1457_p11, %p92_p5 }
  0x10   : > { %p1551_p13 = scmp.ne.s32.totalorder %s2009_s0, %s1550_s30  ;;  %p1557_p4 = scmp.lt.u32.totalorder %s1550_s30, %s2009_s0 }
  0x11   : > { %s2021_s27 = scalar_select %p1816_p12, 1, 0 }
  0x12   : > { %p1552_p0 = pneg %p1811_p10 }
  0x14   : > { %p1553_p1 = pnand %p1552_p0, %p1551_p13 }
  0x16   : > { %p1554_p2 = pneg %p1553_p1 }
  0x18   : > { %p1559_p5 = pnand %p1557_p4, %p1554_p2 }
  0x1a   : > { %1562 = shalt.err (!%p1559_p5)
}
  0x1b   : > { %s1563_s9 = scalar_lea.vmem %s169_s25, 1024  ;;  %p1571_p3 = scmp.lt.s32.totalorder %s169_s25, %s169_s25 }
  0x1c   : > { %p1564_p6 = scmp.ne.s32.totalorder %s169_s25, %s1563_s9  ;;  %p1572_p7 = scmp.lt.s32.totalorder %s1563_s9, %s1563_s9 }
  0x1e   : > { %p1566_p9 = pnand %p1564_p6, %p1552_p0  ;;  %p1573_p8 = por %p1572_p7, %p1571_p3 }
  0x20   : > { %p1567_p11 = pneg %p1566_p9 }
  0x22   : > { %p1574_p12 = pnand %p1573_p8, %p1567_p11 }
  0x24   : > { %1577 = shalt.err (!%p1574_p12)
}
  0x25   : > { %s1727_s10 = smov 64   ;;  %s1728_s11 = smov 4  }
  0x26   : > { %1447 = dma.hbm_to_vmem [thread:$0]  (!%p1811_p10), %s2009_s0, 1024, %s169_s25, [#allocation5], %s1727_s10, %s1727_s10, %s1728_s11  }
  0x27   : > { %s1729_s14 = smov [#allocation7]   ;;  %s1578_s29 = scalar_lea.hbm %s2010_s1, 1024 }
  0x28   : > { %s181_s15 = sshll.u32 %s1729_s14, 4  ;;  %p1579_p3 = scmp.ne.s32.totalorder %s2010_s1, %s1578_s29  ;;  %s182_s15 = int_to_ptr.vmem [resolvable:$true] %s181_s15 }
  0x29   : > { %p1585_p12 = scmp.lt.u32.totalorder %s1578_s29, %s2010_s1 }
  0x2a   : > { %p1581_p7 = pnand %p1579_p3, %p1552_p0 }
  0x2c   : > { %p1582_p8 = pneg %p1581_p7 }
  0x2e   : > { %p1587_p13 = pnand %p1585_p12, %p1582_p8 }
  0x30   : > { %1590 = shalt.err (!%p1587_p13)
}
  0x31   : > { %s1591_s25 = scalar_lea.vmem %s182_s15, 1024  ;;  %p1599_p5 = scmp.lt.s32.totalorder %s182_s15, %s182_s15 }
  0x32   : > { %p1592_p1 = scmp.ne.s32.totalorder %s182_s15, %s1591_s25  ;;  %p1600_p6 = scmp.lt.s32.totalorder %s1591_s25, %s1591_s25 }
  0x34   : > { %p1594_p2 = pnand %p1592_p1, %p1552_p0  ;;  %p1601_p9 = por %p1600_p6, %p1599_p5 }
  0x36   : > { %p1595_p4 = pneg %p1594_p2 }
  0x38   : > { %p1602_p11 = pnand %p1601_p9, %p1595_p4 }
  0x3a   : > { %1605 = shalt.err (!%p1602_p11)
}
  0x3b   : > { %1450 = dma.hbm_to_vmem [thread:$0]  (!%p1811_p10), %s2010_s1, 1024, %s182_s15, [#allocation8], %s1727_s10, %s1727_s10, %s1728_s11  }
  0x3c   : > { %s29_s12 = sadd.s32 1, %s1720_s19  ;;  %s83_s13 = sadd.s32 1, %s1712_s17 }
  0x3d   : > { %p31_p0 = scmp.ge.s32.totalorder %s29_s12, 2  ;;  %s195_s14 = sand.u32 1, %s1724_s20  }
  0x3e   : > { %s197_s26 = sand.u32 1, %s1712_s17   ;;  %s1233_s28 = sshll.u32 %s1720_s19, 10 }
  0x3f   : > { %s2035_s12 = smov (%p31_p0, %s29_s12), 0  ;;  %s1184_s24 = sshll.u32 %s197_s26, 6 }
  0x40   : > { %s80_s29 = ssub.s32 %s1720_s19, %s2035_s12  ;;  %s1880_s6 = scalar_lea.hbm %s2011_s2, %s1233_s28 }
  0x41   : > { %p81_p3 = scmp.eq.s32.totalorder %s80_s29, 0  ;;  %s199_s15 = scalar_lea.vmem [#allocation9], %s1184_s24 }
  0x42   : > { %s206_s7 = sshll.u32 %s199_s15, 4  ;;  %s1887_s8 = scalar_lea.sflag [#allocation5], %s195_s14  ;;  %s1885_s7 = int_to_ptr.vmem [resolvable:$true] %s206_s7 }
  0x43   : > { %s1883_s25 = scalar_select %p81_p3, %s1712_s17, %s83_s13  }
  0x44   : > { %s1606_s9 = scalar_lea.hbm %s1880_s6, 1024  ;;  %p2022_p7 = scmp.ne.s32.totalorder %s2021_s27, 0 }
  0x45   : > { %p1607_p10 = scmp.ne.s32.totalorder %s1880_s6, %s1606_s9  ;;  %s1611_s29 = scalar_lea.hbm %s2011_s2, 2048 }
  0x46   : > { %p1608_p8 = pneg %p2022_p7  ;;  %p1612_p1 = scmp.lt.u32.totalorder %s1880_s6, %s2011_s2 }
  0x47   : > { %p1613_p2 = scmp.lt.u32.totalorder %s1611_s29, %s1606_s9  ;;  %p1615_p5 = scmp.lt.u32.totalorder %s1606_s9, %s1880_s6 }
  0x48   : > { %p1609_p12 = pnand %p1608_p8, %p1607_p10 }
  0x49   : > { %p1614_p4 = por %p1613_p2, %p1612_p1 }
  0x4a   : > { %p1610_p13 = pneg %p1609_p12 }
  0x4b   : > { %p1616_p6 = por %p1615_p5, %p1614_p4 }
  0x4d   : > { %p1617_p9 = pnand %p1616_p6, %p1610_p13 }
  0x4f   : > { %1620 = shalt.err (!%p1617_p9)
}
  0x50   : > { %s1621_s13 = scalar_lea.vmem %s1885_s7, 1024  ;;  %s1730_s14 = smov [#allocation9]  }
  0x51   : > { %p1622_p11 = scmp.ne.s32.totalorder %s1885_s7, %s1621_s13  ;;  %s1626_s5 = sshll.u32 %s1730_s14, 4  ;;  %s1627_s5 = int_to_ptr.vmem [resolvable:$false] %s1626_s5 }
  0x52   : > { %s1628_s15 = scalar_lea.vmem %s1627_s5, 2048  ;;  %p1629_p10 = scmp.lt.s32.totalorder %s1885_s7, %s1627_s5 }
  0x53   : > { %p1624_p0 = pnand %p1622_p11, %p1608_p8  ;;  %p1630_p12 = scmp.lt.s32.totalorder %s1628_s15, %s1621_s13 }
  0x55   : > { %p1625_p3 = pneg %p1624_p0  ;;  %p1631_p1 = por %p1630_p12, %p1629_p10 }
  0x57   : > { %p1632_p2 = pnand %p1631_p1, %p1625_p3 }
  0x59   : > { %1635 = shalt.err (!%p1632_p2)
}
  0x5a   : > { %1454 = dma.hbm_to_vmem [thread:$0]  (!%p2022_p7), %s1880_s6, 1024, %s1885_s7, %s1887_s8, %s1727_s10, %s1727_s10, %s1728_s11  }
  0x5b   : > { %p2023_p8 = scmp.ne.s32.totalorder %s2019_s23, 0 }
  0x5c   : > { %p2024_p13 = scmp.eq.s32.totalorder (!%p2023_p8), %s1788_s21, 0 }
  0x5d   : > { %224 = sbr.rel (%p2023_p8) target bundleno = 942 (0x3ae), region = 36 }
  0x64   : > { %1687 = dma.done.wait (%p2024_p13), [#allocation5], 1024   ;;  %p2025_p4 = pmov %p2024_p13 }
  0x66   : > { %1689 = vsyncadd (%p2025_p4), [#allocation5], 4294966272  ;;  %p2026_p5 = pmov %p2025_p4 }
  0x67   : > { %p2027_p6 = pmov %p2025_p4 }
  0x68   : > { %1691 = dma.done.wait (%p2026_p5), [#allocation8], 1024  }
  0x69   : > { %1693 = vsyncadd (%p2027_p6), [#allocation8], 4294966272  ;;  %s234_s27 = sand.u32 1, %s1788_s21   ;;  %s236_s10 = sand.u32 1, %s1708_s16  }
  0x6a   : > { %s1190_s11 = sshll.u32 %s236_s10, 6  ;;  %s235_s23 = scalar_lea.sflag [#allocation5], %s234_s27 }
  0x6b   : > { %s1930_s6 = scalar_lea.vmem [#allocation9], %s1190_s11  ;;  %p2028_p7 = scmp.ne.s32.totalorder %s2018_s22, 0 }
  0x6d   : > { %1695 = dma.done.wait (%p2028_p7), %s235_s23, 1024  }
  0x6e   : > { %1697 = vsyncadd (%p2028_p7), %s235_s23, 4294966272  ;;  %p261_p9 = scmp.lt.s32.totalorder %s1716_s18, 1  ;;  %p265_p11 = scmp.eq.s32.totalorder %s1716_s18, 0 }
  0x6f   : > { %v1518_v0 = vld [vmem:[%s1930_s6] sm:$0xff] (%p265_p11)   ;;  %v1519_v1 = vld [vmem:[%s1930_s6 + $0x8] sm:$0xff] (%p265_p11)   ;;  %v1520_v2 = vld [vmem:[%s1930_s6 + $0x10] sm:$0xff] (%p265_p11)  }
  0x70   : > { %s262_s7 = scalar_select %p261_p9, %s1716_s18, 1 }
  0x71   : > { %270 = sbr.rel (!%p265_p11) target bundleno = 371 (0x173), region = 52  ;;  %1286 = vmatprep.subr.bf16.mxu0 (%p265_p11), %v1518_v0  ;;  %1382 = vmatprep.subr.bf16.mxu1 (%p265_p11), %v1518_v0  ;;  %v1521_v3 = vld [vmem:[%s1930_s6 + $0x18] sm:$0xff] (%p265_p11)   ;;  %v1526_v4 = vld [vmem:[#allocation7] sm:$0xff] (%p265_p11)   ;;  %v1523_v7 = vld [vmem:[%s1930_s6 + $0x28] sm:$0xff] (%p265_p11)  }
  0x72   : > { %s1944_s26 = scalar_lea.vmem %s2012_s3, %s262_s7  ;;  %1287 = vmatpush3.bf16.msra.mxu0 (%p265_p11), %v1518_v0  ;;  %1390 = vmatpush3.bf16.msra.mxu1 (%p265_p11), %v1518_v0  ;;  %v1527_v5 = vld [vmem:[#allocation7 + $0x20] sm:$0xff] (%p265_p11)   ;;  %v1524_v8 = vld [vmem:[%s1930_s6 + $0x30] sm:$0xff] (%p265_p11)   ;;  %v1525_v9 = vld [vmem:[%s1930_s6 + $0x38] sm:$0xff] (%p265_p11)  }
  0x73   : > { %1288 = vmatprep.subr.bf16.mxu0 (%p265_p11), %v1519_v1  ;;  %1383 = vmatprep.subr.bf16.mxu1 (%p265_p11), %v1519_v1  ;;  %v1522_v6 = vld [vmem:[%s1930_s6 + $0x20] sm:$0xff] (%p265_p11)   ;;  %v1528_v10 = vld [vmem:[#allocation7 + $0x8] sm:$0xff] (%p265_p11)   ;;  %v1530_v12 = vld [vmem:[#allocation7 + $0x10] sm:$0xff] (%p265_p11)  }
  0x74   : > { %1302 = vmatprep.mubr.bf16.mxu0 (%p265_p11), %v1526_v4  ;;  %1310 = vmatprep.mubr.bf16.mxu1 (%p265_p11), %v1527_v5  ;;  %v1529_v11 = vld [vmem:[#allocation7 + $0x28] sm:$0xff] (%p265_p11)   ;;  %v1531_v13 = vld [vmem:[#allocation7 + $0x30] sm:$0xff] (%p265_p11)   ;;  %v1532_v14 = vld [vmem:[#allocation7 + $0x18] sm:$0xff] (%p265_p11)  }
  0x75   : > { %v1533_v15 = vld [vmem:[#allocation7 + $0x38] sm:$0xff] (%p265_p11)  }
  0x76   : > { %1289 = vmatpush3.bf16.msra.mxu0 (%p265_p11), %v1519_v1  ;;  %1391 = vmatpush3.bf16.msra.mxu1 (%p265_p11), %v1519_v1 }
  0x77   : > { %1290 = vmatprep.subr.bf16.mxu0 (%p265_p11), %v1520_v2  ;;  %1384 = vmatprep.subr.bf16.mxu1 (%p265_p11), %v1520_v2 }
  0x7a   : > { %1291 = vmatpush3.bf16.msra.mxu0 %v1520_v2  ;;  %1392 = vmatpush3.bf16.msra.mxu1 %v1520_v2 }
  0x7b   : > { %1292 = vmatprep.subr.bf16.mxu0 %v1521_v3  ;;  %1385 = vmatprep.subr.bf16.mxu1 %v1521_v3 }
  0x7e   : > { %1293 = vmatpush3.bf16.msra.mxu0 %v1521_v3  ;;  %1393 = vmatpush3.bf16.msra.mxu1 %v1521_v3 }
  0x7f   : > { %1294 = vmatprep.subr.bf16.mxu0 %v1522_v6  ;;  %1386 = vmatprep.subr.bf16.mxu1 %v1522_v6 }
  0x82   : > { %1295 = vmatpush3.bf16.msra.mxu0 %v1522_v6  ;;  %1394 = vmatpush3.bf16.msra.mxu1 %v1522_v6 }
  0x83   : > { %1296 = vmatprep.subr.bf16.mxu0 %v1523_v7  ;;  %1387 = vmatprep.subr.bf16.mxu1 %v1523_v7 }
  0x86   : > { %1297 = vmatpush3.bf16.msra.mxu0 %v1523_v7  ;;  %1395 = vmatpush3.bf16.msra.mxu1 %v1523_v7 }
  0x87   : > { %1298 = vmatprep.subr.bf16.mxu0 %v1524_v8  ;;  %1388 = vmatprep.subr.bf16.mxu1 %v1524_v8 }
  0x8a   : > { %1299 = vmatpush3.bf16.msra.mxu0 %v1524_v8  ;;  %1396 = vmatpush3.bf16.msra.mxu1 %v1524_v8 }
  0x8b   : > { %1300 = vmatprep.subr.bf16.mxu0 %v1525_v9  ;;  %1389 = vmatprep.subr.bf16.mxu1 %v1525_v9 }
  0x8e   : > { %1301 = vmatpush3.bf16.msra.mxu0 %v1525_v9  ;;  %1397 = vmatpush3.bf16.msra.mxu1 %v1525_v9 }
  0x91   : > { %1303 = vmatmul.mubr.bf16.vlgmr.msra.gmra.mrb[0].mxu0 %v1528_v10  ;;  %1311 = vmatmul.mubr.bf16.vlgmr.msra.gmra.mrb[0].mxu1 %v1529_v11 }
  0x92   : > { %1306 = vmatprep.mubr.bf16.mxu0 %v1530_v12  ;;  %1314 = vmatprep.mubr.bf16.mxu1 %v1531_v13 }
  0x99   : > { %1307 = vmatmul.mubr.bf16.gmra.mrb[4].mxu0 %v1532_v14  ;;  %1315 = vmatmul.mubr.bf16.gmra.mrb[4].mxu1 %v1533_v15 }
 0x164   : > { %v1304_v16 = vpop.f32.mrb[0].mxu0  ;;  %v1312_v17 = vpop.f32.mrb[0].mxu1 }
 0x165   : > { %v433_v18 = vpop.f32.mrb[1].mxu0  ;;  %v465_v19 = vpop.f32.mrb[1].mxu1 }
 0x166   : > { %v1305_v20 = vpop.f32.mrb[2].mxu0  ;;  %v1313_v21 = vpop.f32.mrb[2].mxu1 }
 0x167   : > { %v497_v22 = vpack.c.bf16 %v1305_v20, %v1304_v16  ;;  %v501_v23 = vpack.c.bf16 %v1313_v21, %v1312_v17  ;;  %v436_v24 = vpop.f32.mrb[3].mxu0  ;;  %v468_v25 = vpop.f32.mrb[3].mxu1 }
 0x168   : > { %v496_v26 = vpack.c.bf16 %v436_v24, %v433_v18  ;;  %v500_v27 = vpack.c.bf16 %v468_v25, %v465_v19 }
 0x169   : > { %505 = vst [vmem:[#allocation2 + $0x8] sm:$0xff] %v497_v22  ;;  %509 = vst [vmem:[#allocation2 + $0x28] sm:$0xff] %v501_v23 }
 0x16a   : > { %504 = vst [vmem:[#allocation2] sm:$0xff] %v496_v26  ;;  %508 = vst [vmem:[#allocation2 + $0x20] sm:$0xff] %v500_v27 }
 0x16c   : > { %v1308_v28 = vpop.f32.mrb[4].mxu0  ;;  %v1316_v29 = vpop.f32.mrb[4].mxu1 }
 0x16d   : > { %v449_v30 = vpop.f32.mrb[5].mxu0  ;;  %v481_v31 = vpop.f32.mrb[5].mxu1 }
 0x16e   : > { %v1309_v32 = vpop.f32.mrb[6].mxu0  ;;  %v1317_v33 = vpop.f32.mrb[6].mxu1 }
 0x16f   : > { %v499_v34 = vpack.c.bf16 %v1309_v32, %v1308_v28  ;;  %v503_v35 = vpack.c.bf16 %v1317_v33, %v1316_v29  ;;  %v452_v36 = vpop.f32.mrb[7].mxu0  ;;  %v484_v37 = vpop.f32.mrb[7].mxu1 }
 0x170   : > { %v498_v38 = vpack.c.bf16 %v452_v36, %v449_v30  ;;  %v502_v39 = vpack.c.bf16 %v484_v37, %v481_v31 }
 0x171   : > { %507 = vst [vmem:[#allocation2 + $0x18] sm:$0xff] %v499_v34  ;;  %511 = vst [vmem:[#allocation2 + $0x38] sm:$0xff] %v503_v35 }
 0x172   : > { %506 = vst [vmem:[#allocation2 + $0x10] sm:$0xff] %v498_v38  ;;  %510 = vst [vmem:[#allocation2 + $0x30] sm:$0xff] %v502_v39 }
 0x173 PF: > { %p512_p0 = scmp.gt.s32.totalorder %s1716_s18, 0 }
 0x174   : > { %v1534_v40 = vld [vmem:[%s1930_s6] sm:$0xff] (%p512_p0)   ;;  %v1535_v41 = vld [vmem:[%s1930_s6 + $0x8] sm:$0xff] (%p512_p0)   ;;  %v1536_v42 = vld [vmem:[%s1930_s6 + $0x10] sm:$0xff] (%p512_p0)  }
 0x175   : > { %516 = sbr.rel (!%p512_p0) target bundleno = 631 (0x277), region = 56  ;;  %1318 = vmatprep.subr.bf16.mxu0 (%p512_p0), %v1534_v40  ;;  %1398 = vmatprep.subr.bf16.mxu1 (%p512_p0), %v1534_v40  ;;  %v1537_v43 = vld [vmem:[%s1930_s6 + $0x18] sm:$0xff] (%p512_p0)   ;;  %v517_v44 = vld [vmem:[#allocation2] sm:$0xff] (%p512_p0)  ;;  %v1539_v47 = vld [vmem:[%s1930_s6 + $0x28] sm:$0xff] (%p512_p0)  }
 0x176   : > { %1319 = vmatpush3.bf16.msra.mxu0 (%p512_p0), %v1534_v40  ;;  %1406 = vmatpush3.bf16.msra.mxu1 (%p512_p0), %v1534_v40  ;;  %v521_v45 = vld [vmem:[#allocation2 + $0x20] sm:$0xff] (%p512_p0)  ;;  %v1540_v48 = vld [vmem:[%s1930_s6 + $0x30] sm:$0xff] (%p512_p0)   ;;  %v1541_v49 = vld [vmem:[%s1930_s6 + $0x38] sm:$0xff] (%p512_p0)  }
 0x177   : > { %1320 = vmatprep.subr.bf16.mxu0 (%p512_p0), %v1535_v41  ;;  %1399 = vmatprep.subr.bf16.mxu1 (%p512_p0), %v1535_v41  ;;  %v1538_v46 = vld [vmem:[%s1930_s6 + $0x20] sm:$0xff] (%p512_p0)   ;;  %v518_v50 = vld [vmem:[#allocation2 + $0x8] sm:$0xff] (%p512_p0) }
 0x178   : > { %1334 = vmatprep.mubr.bf16.mxu0 (%p512_p0), %v517_v44  ;;  %1342 = vmatprep.mubr.bf16.mxu1 (%p512_p0), %v521_v45  ;;  %v522_v51 = vld [vmem:[#allocation2 + $0x28] sm:$0xff] (%p512_p0)  ;;  %v520_v54 = vld [vmem:[#allocation2 + $0x18] sm:$0xff] (%p512_p0) }
 0x179   : > { %v519_v52 = vld [vmem:[#allocation2 + $0x10] sm:$0xff] (%p512_p0)  ;;  %v524_v55 = vld [vmem:[#allocation2 + $0x38] sm:$0xff] (%p512_p0) }
 0x17a   : > { %1321 = vmatpush3.bf16.msra.mxu0 (%p512_p0), %v1535_v41  ;;  %1407 = vmatpush3.bf16.msra.mxu1 (%p512_p0), %v1535_v41  ;;  %v523_v53 = vld [vmem:[#allocation2 + $0x30] sm:$0xff] (%p512_p0) }
 0x17b   : > { %1322 = vmatprep.subr.bf16.mxu0 (%p512_p0), %v1536_v42  ;;  %1400 = vmatprep.subr.bf16.mxu1 (%p512_p0), %v1536_v42 }
 0x17e   : > { %1323 = vmatpush3.bf16.msra.mxu0 %v1536_v42  ;;  %1408 = vmatpush3.bf16.msra.mxu1 %v1536_v42 }
 0x17f   : > { %1324 = vmatprep.subr.bf16.mxu0 %v1537_v43  ;;  %1401 = vmatprep.subr.bf16.mxu1 %v1537_v43 }
 0x182   : > { %1325 = vmatpush3.bf16.msra.mxu0 %v1537_v43  ;;  %1409 = vmatpush3.bf16.msra.mxu1 %v1537_v43 }
 0x183   : > { %1326 = vmatprep.subr.bf16.mxu0 %v1538_v46  ;;  %1402 = vmatprep.subr.bf16.mxu1 %v1538_v46 }
 0x186   : > { %1327 = vmatpush3.bf16.msra.mxu0 %v1538_v46  ;;  %1410 = vmatpush3.bf16.msra.mxu1 %v1538_v46 }
 0x187   : > { %1328 = vmatprep.subr.bf16.mxu0 %v1539_v47  ;;  %1403 = vmatprep.subr.bf16.mxu1 %v1539_v47 }
 0x18a   : > { %1329 = vmatpush3.bf16.msra.mxu0 %v1539_v47  ;;  %1411 = vmatpush3.bf16.msra.mxu1 %v1539_v47 }
 0x18b   : > { %1330 = vmatprep.subr.bf16.mxu0 %v1540_v48  ;;  %1404 = vmatprep.subr.bf16.mxu1 %v1540_v48 }
 0x18e   : > { %1331 = vmatpush3.bf16.msra.mxu0 %v1540_v48  ;;  %1412 = vmatpush3.bf16.msra.mxu1 %v1540_v48 }
 0x18f   : > { %1332 = vmatprep.subr.bf16.mxu0 %v1541_v49  ;;  %1405 = vmatprep.subr.bf16.mxu1 %v1541_v49 }
 0x192   : > { %1333 = vmatpush3.bf16.msra.mxu0 %v1541_v49  ;;  %1413 = vmatpush3.bf16.msra.mxu1 %v1541_v49 }
 0x195   : > { %1335 = vmatmul.mubr.bf16.vlgmr.msra.gmra.mrb[0].mxu0 %v518_v50  ;;  %1343 = vmatmul.mubr.bf16.vlgmr.msra.gmra.mrb[0].mxu1 %v522_v51 }
 0x196   : > { %1338 = vmatprep.mubr.bf16.mxu0 %v519_v52  ;;  %1346 = vmatprep.mubr.bf16.mxu1 %v523_v53 }
 0x19d   : > { %1339 = vmatmul.mubr.bf16.gmra.mrb[4].mxu0 %v520_v54  ;;  %1347 = vmatmul.mubr.bf16.gmra.mrb[4].mxu1 %v524_v55 }
 0x268   : > { %v1336_v56 = vpop.f32.mrb[0].mxu0  ;;  %v1344_v57 = vpop.f32.mrb[0].mxu1 }
 0x269   : > { %v623_v58 = vpop.f32.mrb[1].mxu0  ;;  %v655_v59 = vpop.f32.mrb[1].mxu1 }
 0x26a   : > { %v1337_v60 = vpop.f32.mrb[2].mxu0  ;;  %v1345_v61 = vpop.f32.mrb[2].mxu1 }
 0x26b   : > { %v687_v62 = vpack.c.bf16 %v1337_v60, %v1336_v56  ;;  %v691_v63 = vpack.c.bf16 %v1345_v61, %v1344_v57  ;;  %v626_v0 = vpop.f32.mrb[3].mxu0  ;;  %v658_v1 = vpop.f32.mrb[3].mxu1 }
 0x26c   : > { %v686_v2 = vpack.c.bf16 %v626_v0, %v623_v58  ;;  %v690_v3 = vpack.c.bf16 %v658_v1, %v655_v59 }
 0x26d   : > { %695 = vst [vmem:[#allocation2 + $0x8] sm:$0xff] %v687_v62  ;;  %699 = vst [vmem:[#allocation2 + $0x28] sm:$0xff] %v691_v63 }
 0x26e   : > { %694 = vst [vmem:[#allocation2] sm:$0xff] %v686_v2  ;;  %698 = vst [vmem:[#allocation2 + $0x20] sm:$0xff] %v690_v3 }
 0x270   : > { %v1340_v4 = vpop.f32.mrb[4].mxu0  ;;  %v1348_v5 = vpop.f32.mrb[4].mxu1 }
 0x271   : > { %v639_v6 = vpop.f32.mrb[5].mxu0  ;;  %v671_v7 = vpop.f32.mrb[5].mxu1 }
 0x272   : > { %v1341_v8 = vpop.f32.mrb[6].mxu0  ;;  %v1349_v9 = vpop.f32.mrb[6].mxu1 }
 0x273   : > { %v689_v10 = vpack.c.bf16 %v1341_v8, %v1340_v4  ;;  %v693_v11 = vpack.c.bf16 %v1349_v9, %v1348_v5  ;;  %v642_v12 = vpop.f32.mrb[7].mxu0  ;;  %v674_v13 = vpop.f32.mrb[7].mxu1 }
 0x274   : > { %v688_v14 = vpack.c.bf16 %v642_v12, %v639_v6  ;;  %v692_v15 = vpack.c.bf16 %v674_v13, %v671_v7 }
 0x275   : > { %697 = vst [vmem:[#allocation2 + $0x18] sm:$0xff] %v689_v10  ;;  %701 = vst [vmem:[#allocation2 + $0x38] sm:$0xff] %v693_v11 }
 0x276   : > { %696 = vst [vmem:[#allocation2 + $0x10] sm:$0xff] %v688_v14  ;;  %700 = vst [vmem:[#allocation2 + $0x30] sm:$0xff] %v692_v15 }
 0x277 PF: > { %v758_v16 = vld [vmem:[#allocation2] sm:$0xff]  ;;  %v759_v17 = vld [vmem:[#allocation2 + $0x8] sm:$0xff]  ;;  %v1546_v28 = vld [vmem:[#allocation4 + $0x10] sm:$0xff]  }
 0x278   : > { %1350 = vmatprep.subr.bf16.mxu0 %v758_v16  ;;  %1414 = vmatprep.subr.bf16.mxu1 %v758_v16  ;;  %v1542_v19 = vld [vmem:[#allocation4] sm:$0xff]   ;;  %v763_v23 = vld [vmem:[#allocation2 + $0x28] sm:$0xff]  ;;  %v1547_v29 = vld [vmem:[#allocation4 + $0x30] sm:$0xff]  }
 0x279   : > { %1351 = vmatpush3.bf16.msra.mxu0 %v758_v16  ;;  %1422 = vmatpush3.bf16.msra.mxu1 %v758_v16  ;;  %v1543_v20 = vld [vmem:[#allocation4 + $0x20] sm:$0xff]   ;;  %v1544_v26 = vld [vmem:[#allocation4 + $0x8] sm:$0xff]   ;;  %v1548_v30 = vld [vmem:[#allocation4 + $0x18] sm:$0xff]  }
 0x27a   : > { %1352 = vmatprep.subr.bf16.mxu0 %v759_v17  ;;  %1415 = vmatprep.subr.bf16.mxu1 %v759_v17  ;;  %v762_v22 = vld [vmem:[#allocation2 + $0x20] sm:$0xff]  ;;  %v1545_v27 = vld [vmem:[#allocation4 + $0x28] sm:$0xff]   ;;  %v1549_v31 = vld [vmem:[#allocation4 + $0x38] sm:$0xff]  }
 0x27b   : > { %1366 = vmatprep.mubr.bf16.mxu0 %v1542_v19  ;;  %1374 = vmatprep.mubr.bf16.mxu1 %v1543_v20  ;;  %v1226_v50 = vld [vmem:[%s1944_s26] ss:$0 sm:$0xff] (%p261_p9) }
 0x27c   : > { %v761_v21 = vld [vmem:[#allocation2 + $0x18] sm:$0xff] }
 0x27d   : > { %v760_v18 = vld [vmem:[#allocation2 + $0x10] sm:$0xff]  ;;  %1353 = vmatpush3.bf16.msra.mxu0 %v759_v17  ;;  %1423 = vmatpush3.bf16.msra.mxu1 %v759_v17  ;;  %v765_v25 = vld [vmem:[#allocation2 + $0x38] sm:$0xff] }
 0x27e   : > { %1354 = vmatprep.subr.bf16.mxu0 %v760_v18  ;;  %1416 = vmatprep.subr.bf16.mxu1 %v760_v18  ;;  %v764_v24 = vld [vmem:[#allocation2 + $0x30] sm:$0xff] }
 0x281   : > { %1355 = vmatpush3.bf16.msra.mxu0 %v760_v18  ;;  %1424 = vmatpush3.bf16.msra.mxu1 %v760_v18 }
 0x282   : > { %1356 = vmatprep.subr.bf16.mxu0 %v761_v21  ;;  %1417 = vmatprep.subr.bf16.mxu1 %v761_v21 }
 0x285   : > { %1357 = vmatpush3.bf16.msra.mxu0 %v761_v21  ;;  %1425 = vmatpush3.bf16.msra.mxu1 %v761_v21 }
 0x286   : > { %1358 = vmatprep.subr.bf16.mxu0 %v762_v22  ;;  %1418 = vmatprep.subr.bf16.mxu1 %v762_v22 }
 0x289   : > { %1359 = vmatpush3.bf16.msra.mxu0 %v762_v22  ;;  %1426 = vmatpush3.bf16.msra.mxu1 %v762_v22 }
 0x28a   : > { %1360 = vmatprep.subr.bf16.mxu0 %v763_v23  ;;  %1419 = vmatprep.subr.bf16.mxu1 %v763_v23 }
 0x28d   : > { %1361 = vmatpush3.bf16.msra.mxu0 %v763_v23  ;;  %1427 = vmatpush3.bf16.msra.mxu1 %v763_v23 }
 0x28e   : > { %1362 = vmatprep.subr.bf16.mxu0 %v764_v24  ;;  %1420 = vmatprep.subr.bf16.mxu1 %v764_v24 }
 0x291   : > { %1363 = vmatpush3.bf16.msra.mxu0 %v764_v24  ;;  %1428 = vmatpush3.bf16.msra.mxu1 %v764_v24 }
 0x292   : > { %1364 = vmatprep.subr.bf16.mxu0 %v765_v25  ;;  %1421 = vmatprep.subr.bf16.mxu1 %v765_v25 }
 0x295   : > { %1365 = vmatpush3.bf16.msra.mxu0 %v765_v25  ;;  %1429 = vmatpush3.bf16.msra.mxu1 %v765_v25 }
 0x298   : > { %1367 = vmatmul.mubr.bf16.vlgmr.msra.gmra.mrb[0].mxu0 %v1544_v26  ;;  %1375 = vmatmul.mubr.bf16.vlgmr.msra.gmra.mrb[0].mxu1 %v1545_v27 }
 0x299   : > { %1370 = vmatprep.mubr.bf16.mxu0 %v1546_v28  ;;  %1378 = vmatprep.mubr.bf16.mxu1 %v1547_v29 }
 0x2a0   : > { %1371 = vmatmul.mubr.bf16.gmra.mrb[4].mxu0 %v1548_v30  ;;  %1379 = vmatmul.mubr.bf16.gmra.mrb[4].mxu1 %v1549_v31 }
 0x36b   : > { %v1368_v32 = vpop.f32.mrb[0].mxu0  ;;  %v1376_v33 = vpop.f32.mrb[0].mxu1 }
 0x36c   : > { %v848_v34 = vpop.f32.mrb[1].mxu0  ;;  %v880_v35 = vpop.f32.mrb[1].mxu1  ;;  %929 = vst [vmem:[#allocation3 + $0x10] sm:$0xff] %v1368_v32  ;;  %937 = vst [vmem:[#allocation3 + $0x50] sm:$0xff] %v1376_v33 }
 0x36d   : > { %v1369_v36 = vpop.f32.mrb[2].mxu0  ;;  %v1377_v37 = vpop.f32.mrb[2].mxu1  ;;  %927 = vst [vmem:[#allocation3] sm:$0xff] %v848_v34  ;;  %935 = vst [vmem:[#allocation3 + $0x40] sm:$0xff] %v880_v35 }
 0x36e   : > { %v851_v38 = vpop.f32.mrb[3].mxu0  ;;  %v883_v39 = vpop.f32.mrb[3].mxu1  ;;  %930 = vst [vmem:[#allocation3 + $0x18] sm:$0xff] %v1369_v36  ;;  %938 = vst [vmem:[#allocation3 + $0x58] sm:$0xff] %v1377_v37 }
 0x36f   : > { %928 = vst [vmem:[#allocation3 + $0x8] sm:$0xff] %v851_v38  ;;  %936 = vst [vmem:[#allocation3 + $0x48] sm:$0xff] %v883_v39 }
 0x371   : > { %947 = sbr.rel (!%p261_p9) target bundleno = 903 (0x387), region = 64 }
 0x373   : > { %v1372_v40 = vpop.f32.mrb[4].mxu0  ;;  %v1380_v41 = vpop.f32.mrb[4].mxu1  ;;  %v950_v53 = vld [vmem:[#allocation3 + $0x10] sm:$0xff] (%p261_p9) }
 0x374   : > { %v864_v42 = vpop.f32.mrb[5].mxu0  ;;  %v896_v43 = vpop.f32.mrb[5].mxu1  ;;  %933 = vst [vmem:[#allocation3 + $0x30] sm:$0xff] %v1372_v40  ;;  %941 = vst [vmem:[#allocation3 + $0x70] sm:$0xff] %v1380_v41  ;;  %v948_v48 = vld [vmem:[#allocation3] sm:$0xff] (%p261_p9)  ;;  %v973_v56 = vadd.f32 (%p261_p9), %v1226_v50, %v950_v53  ;;  %v958_v4 = vld [vmem:[#allocation3 + $0x50] sm:$0xff] (%p261_p9) }
 0x375   : > { %v1373_v44 = vpop.f32.mrb[6].mxu0  ;;  %v1381_v45 = vpop.f32.mrb[6].mxu1  ;;  %931 = vst [vmem:[#allocation3 + $0x20] sm:$0xff] %v864_v42  ;;  %939 = vst [vmem:[#allocation3 + $0x60] sm:$0xff] %v896_v43  ;;  %v971_v51 = vadd.f32 (%p261_p9), %v1226_v50, %v948_v48  ;;  %v951_v54 = vld [vmem:[#allocation3 + $0x18] sm:$0xff] (%p261_p9)  ;;  %v956_v2 = vld [vmem:[#allocation3 + $0x40] sm:$0xff] (%p261_p9)  ;;  %v981_v19 = vadd.f32 (%p261_p9), %v1226_v50, %v958_v4 }
 0x376   : > { %v867_v46 = vpop.f32.mrb[7].mxu0  ;;  %v899_v47 = vpop.f32.mrb[7].mxu1  ;;  %934 = vst [vmem:[#allocation3 + $0x38] sm:$0xff] %v1373_v44  ;;  %942 = vst [vmem:[#allocation3 + $0x78] sm:$0xff] %v1381_v45  ;;  %v949_v49 = vld [vmem:[#allocation3 + $0x8] sm:$0xff] (%p261_p9)  ;;  %v974_v57 = vadd.f32 (%p261_p9), %v1226_v50, %v951_v54  ;;  %v989_v5 = vmax.f32 (%p261_p9), %v973_v56, 0.0  ;;  %v979_v14 = vadd.f32 (%p261_p9), %v1226_v50, %v956_v2 }
 0x377   : > { %932 = vst [vmem:[#allocation3 + $0x28] sm:$0xff] %v867_v46  ;;  %940 = vst [vmem:[#allocation3 + $0x68] sm:$0xff] %v899_v47  ;;  %v972_v52 = vadd.f32 (%p261_p9), %v1226_v50, %v949_v49  ;;  %v987_v62 = vmax.f32 (%p261_p9), %v971_v51, 0.0  ;;  %v957_v3 = vld [vmem:[#allocation3 + $0x48] sm:$0xff] (%p261_p9)  ;;  %v959_v9 = vld [vmem:[#allocation3 + $0x58] sm:$0xff] (%p261_p9)  ;;  %v997_v28 = vmax.f32 (%p261_p9), %v981_v19, 0.0 }
 0x378   : > { %v990_v6 = vmax.f32 %v974_v57, 0.0  ;;  %v980_v18 = vadd.f32 %v1226_v50, %v957_v3  ;;  %v995_v23 = vmax.f32 %v979_v14, 0.0  ;;  %v982_v24 = vadd.f32 %v1226_v50, %v959_v9 }
 0x379   : > { %v988_v63 = vmax.f32 %v972_v52, 0.0 }
 0x37a   : > { %v1004_v16 = vpack.c.bf16 %v990_v6, %v989_v5  ;;  %v996_v27 = vmax.f32 %v980_v18, 0.0  ;;  %v998_v30 = vmax.f32 %v982_v24, 0.0 }
 0x37b   : > { %v954_v60 = vld [vmem:[#allocation3 + $0x30] sm:$0xff]  ;;  %v1003_v11 = vpack.c.bf16 %v988_v63, %v987_v62 }
 0x37c   : > { %v952_v55 = vld [vmem:[#allocation3 + $0x20] sm:$0xff]  ;;  %v977_v1 = vadd.f32 %v1226_v50, %v954_v60  ;;  %v962_v20 = vld [vmem:[#allocation3 + $0x70] sm:$0xff]  ;;  %1012 = vst [vmem:[#allocation2 + $0x8] sm:$0xff] %v1004_v16  ;;  %v1007_v34 = vpack.c.bf16 %v996_v27, %v995_v23  ;;  %v1008_v36 = vpack.c.bf16 %v998_v30, %v997_v28 }
 0x37d   : > { %v975_v59 = vadd.f32 %v1226_v50, %v952_v55  ;;  %v955_v61 = vld [vmem:[#allocation3 + $0x38] sm:$0xff]  ;;  %v960_v10 = vld [vmem:[#allocation3 + $0x60] sm:$0xff]  ;;  %1011 = vst [vmem:[#allocation2] sm:$0xff] %v1003_v11  ;;  %v985_v32 = vadd.f32 %v1226_v50, %v962_v20 }
 0x37e   : > { %v953_v58 = vld [vmem:[#allocation3 + $0x28] sm:$0xff]  ;;  %v978_v8 = vadd.f32 %v1226_v50, %v955_v61  ;;  %v993_v13 = vmax.f32 %v977_v1, 0.0  ;;  %v963_v21 = vld [vmem:[#allocation3 + $0x78] sm:$0xff]  ;;  %v983_v25 = vadd.f32 %v1226_v50, %v960_v10  ;;  %1015 = vst [vmem:[#allocation2 + $0x20] sm:$0xff] %v1007_v34  ;;  %1016 = vst [vmem:[#allocation2 + $0x28] sm:$0xff] %v1008_v36 }
 0x37f   : > { %v976_v0 = vadd.f32 %v1226_v50, %v953_v58  ;;  %v991_v7 = vmax.f32 %v975_v59, 0.0  ;;  %v961_v15 = vld [vmem:[#allocation3 + $0x68] sm:$0xff]  ;;  %v986_v33 = vadd.f32 %v1226_v50, %v963_v21  ;;  %v1001_v37 = vmax.f32 %v985_v32, 0.0 }
 0x380   : > { %v994_v17 = vmax.f32 %v978_v8, 0.0  ;;  %v984_v29 = vadd.f32 %v1226_v50, %v961_v15  ;;  %v999_v31 = vmax.f32 %v983_v25, 0.0 }
 0x381   : > { %v992_v12 = vmax.f32 %v976_v0, 0.0  ;;  %v1002_v38 = vmax.f32 %v986_v33, 0.0 }
 0x382   : > { %v1006_v26 = vpack.c.bf16 %v994_v17, %v993_v13  ;;  %v1000_v35 = vmax.f32 %v984_v29, 0.0 }
 0x383   : > { %v1005_v22 = vpack.c.bf16 %v992_v12, %v991_v7  ;;  %v1010_v40 = vpack.c.bf16 %v1002_v38, %v1001_v37 }
 0x384   : > { %1014 = vst [vmem:[#allocation2 + $0x18] sm:$0xff] %v1006_v26  ;;  %v1009_v39 = vpack.c.bf16 %v1000_v35, %v999_v31 }
 0x385   : > { %1013 = vst [vmem:[#allocation2 + $0x10] sm:$0xff] %v1005_v22  ;;  %1018 = vst [vmem:[#allocation2 + $0x38] sm:$0xff] %v1010_v40 }
 0x386   : > { %1017 = vst [vmem:[#allocation2 + $0x30] sm:$0xff] %v1009_v39 }
 0x387 PF: > { %p1019_p3 = scmp.eq.s32.totalorder %s1716_s18, 1 }
 0x388   : > { %v1024_v41 = vld [vmem:[#allocation3] sm:$0xff] (%p1019_p3)  ;;  %v1025_v43 = vld [vmem:[#allocation3 + $0x8] sm:$0xff] (%p1019_p3)  ;;  %v1026_v46 = vld [vmem:[#allocation3 + $0x10] sm:$0xff] (%p1019_p3) }
 0x389   : > { %1023 = sbr.rel (!%p1019_p3) target bundleno = 916 (0x394), region = 68  ;;  %v1228_v42 = vld [vmem:[%s1944_s26] ss:$0 sm:$0xff] (%p1019_p3)  ;;  %v1027_v47 = vld [vmem:[#allocation3 + $0x18] sm:$0xff] (%p1019_p3)  ;;  %v1033_v59 = vld [vmem:[#allocation3 + $0x48] sm:$0xff] (%p1019_p3) }
 0x38a   : > { %v1047_v44 = vadd.f32 (%p1019_p3), %v1228_v42, %v1024_v41  ;;  %v1048_v45 = vadd.f32 (%p1019_p3), %v1228_v42, %v1025_v43  ;;  %v1049_v49 = vadd.f32 (%p1019_p3), %v1228_v42, %v1026_v46  ;;  %v1050_v50 = vadd.f32 (%p1019_p3), %v1228_v42, %v1027_v47  ;;  %v1030_v53 = vld [vmem:[#allocation3 + $0x30] sm:$0xff] (%p1019_p3)  ;;  %v1032_v58 = vld [vmem:[#allocation3 + $0x40] sm:$0xff] (%p1019_p3)  ;;  %v1035_v0 = vld [vmem:[#allocation3 + $0x58] sm:$0xff] (%p1019_p3) }
 0x38b   : > { %v1028_v48 = vld [vmem:[#allocation3 + $0x20] sm:$0xff] (%p1019_p3)  ;;  %v1053_v56 = vadd.f32 (%p1019_p3), %v1228_v42, %v1030_v53  ;;  %v1034_v60 = vld [vmem:[#allocation3 + $0x50] sm:$0xff] (%p1019_p3)  ;;  %v1055_v61 = vadd.f32 (%p1019_p3), %v1228_v42, %v1032_v58  ;;  %v1056_v62 = vadd.f32 (%p1019_p3), %v1228_v42, %v1033_v59  ;;  %v1058_v3 = vadd.f32 (%p1019_p3), %v1228_v42, %v1035_v0 }
 0x38c   : > { %v1051_v51 = vadd.f32 (%p1019_p3), %v1228_v42, %v1028_v48  ;;  %v1031_v54 = vld [vmem:[#allocation3 + $0x38] sm:$0xff] (%p1019_p3)  ;;  %1063 = vst [vmem:[#allocation10] sm:$0xff] (%p1019_p3), %v1047_v44  ;;  %1064 = vst [vmem:[#allocation10 + $0x8] sm:$0xff] (%p1019_p3), %v1048_v45  ;;  %v1057_v63 = vadd.f32 (%p1019_p3), %v1228_v42, %v1034_v60  ;;  %v1036_v1 = vld [vmem:[#allocation3 + $0x60] sm:$0xff] (%p1019_p3) }
 0x38d   : > { %v1029_v52 = vld [vmem:[#allocation3 + $0x28] sm:$0xff] (%p1019_p3)  ;;  %v1054_v57 = vadd.f32 (%p1019_p3), %v1228_v42, %v1031_v54  ;;  %1065 = vst [vmem:[#allocation10 + $0x10] sm:$0xff] (%p1019_p3), %v1049_v49  ;;  %1066 = vst [vmem:[#allocation10 + $0x18] sm:$0xff] (%p1019_p3), %v1050_v50  ;;  %v1059_v4 = vadd.f32 (%p1019_p3), %v1228_v42, %v1036_v1  ;;  %v1038_v6 = vld [vmem:[#allocation3 + $0x70] sm:$0xff] (%p1019_p3) }
 0x38e   : > { %v1052_v55 = vadd.f32 (%p1019_p3), %v1228_v42, %v1029_v52  ;;  %1067 = vst [vmem:[#allocation10 + $0x20] sm:$0xff] (%p1019_p3), %v1051_v51  ;;  %v1037_v2 = vld [vmem:[#allocation3 + $0x68] sm:$0xff] (%p1019_p3)  ;;  %1069 = vst [vmem:[#allocation10 + $0x30] sm:$0xff] (%p1019_p3), %v1053_v56  ;;  %v1039_v7 = vld [vmem:[#allocation3 + $0x78] sm:$0xff] (%p1019_p3)  ;;  %v1061_v8 = vadd.f32 (%p1019_p3), %v1228_v42, %v1038_v6 }
 0x38f   : > { %1070 = vst [vmem:[#allocation10 + $0x38] sm:$0xff] (%p1019_p3), %v1054_v57  ;;  %v1060_v5 = vadd.f32 (%p1019_p3), %v1228_v42, %v1037_v2  ;;  %1071 = vst [vmem:[#allocation10 + $0x40] sm:$0xff] (%p1019_p3), %v1055_v61  ;;  %v1062_v9 = vadd.f32 (%p1019_p3), %v1228_v42, %v1039_v7 }
 0x390   : > { %1068 = vst [vmem:[#allocation10 + $0x28] sm:$0xff] %v1052_v55  ;;  %1072 = vst [vmem:[#allocation10 + $0x48] sm:$0xff] %v1056_v62 }
 0x391   : > { %1073 = vst [vmem:[#allocation10 + $0x50] sm:$0xff] %v1057_v63  ;;  %1074 = vst [vmem:[#allocation10 + $0x58] sm:$0xff] %v1058_v3 }
 0x392   : > { %1075 = vst [vmem:[#allocation10 + $0x60] sm:$0xff] %v1059_v4  ;;  %1076 = vst [vmem:[#allocation10 + $0x68] sm:$0xff] %v1060_v5 }
 0x393   : > { %1077 = vst [vmem:[#allocation10 + $0x70] sm:$0xff] %v1061_v8  ;;  %1078 = vst [vmem:[#allocation10 + $0x78] sm:$0xff] %v1062_v9 }
 0x394 PF: > { %p1460_p10 = scmp.eq.s32.totalorder %s1788_s21, 1  ;;  %s1731_s18 = smov [#allocation10]  }
 0x395   : > { %s1085_s22 = sshll.u32 %s1731_s18, 4  ;;  %s1086_s22 = int_to_ptr.vmem [resolvable:$true] %s1085_s22 }
 0x396   : > { %s1636_s28 = scalar_lea.vmem %s1086_s22, 2048  ;;  %p1643_p8 = scmp.lt.s32.totalorder %s1086_s22, %s1086_s22 }
 0x397   : > { %p1637_p12 = scmp.ne.s32.totalorder %s1086_s22, %s1636_s28  ;;  %p1644_p13 = scmp.lt.s32.totalorder %s1636_s28, %s1636_s28 }
 0x399   : > { %p1638_p1 = pnand %p1637_p12, %p1460_p10  ;;  %p1645_p4 = por %p1644_p13, %p1643_p8 }
 0x39b   : > { %p1639_p2 = pneg %p1638_p1 }
 0x39d   : > { %p1646_p5 = pnand %p1645_p4, %p1639_p2 }
 0x39f   : > { %1649 = shalt.err (!%p1646_p5)
}
 0x3a0   : > { %s1650_s30 = scalar_lea.hbm %s2013_s4, 2048 }
 0x3a1   : > { %p1651_p6 = scmp.ne.s32.totalorder %s2013_s4, %s1650_s30  ;;  %p1656_p11 = scmp.lt.u32.totalorder %s1650_s30, %s2013_s4 }
 0x3a3   : > { %p1652_p7 = pnand %p1651_p6, %p1460_p10 }
 0x3a5   : > { %p1653_p9 = pneg %p1652_p7 }
 0x3a7   : > { %p1658_p0 = pnand %p1656_p11, %p1653_p9 }
 0x3a9   : > { %1661 = shalt.err (!%p1658_p0)
}
 0x3aa   : > { %s1732_s27 = smov 128   ;;  %s1733_s10 = smov 8  }
 0x3ab   : > { %1441 = dma.vmem_to_hbm [thread:$0]  (%p1460_p10), %s1086_s22, 2048, %s2013_s4, [#allocation6], %s1732_s27, %s1732_s27, %s1733_s10  }
 0x3ac   : > { %1699 = dma.done.wait (%p1460_p10), [#allocation6], 2048  }
 0x3ad   : > { %1701 = vsyncadd (%p1460_p10), [#allocation6], 4294965248 }
 0x3ae PF: > { %s17_s20 = sadd.s32 1, %s1724_s20   ;;  %s2029_s15 = smov %s1708_s16 }
 0x3af   : > { %p14_p3 = scmp.ge.s32.totalorder %s17_s20, 4   ;;  %s2030_s16 = smov %s1712_s17 }
 0x3b0   : > { %s2031_s17 = smov %s1883_s25  ;;  %s2032_s18 = smov %s1720_s19 }
 0x3b1   : > { %s2033_s19 = smov %s2035_s12  ;;  %16 = sbr.rel (!%p14_p3) target bundleno = 5 (0x5), region = 105 }
 0x3b8   :  { %1101 = vsyncpa [#allocation5], 1 }
 0x3b9   :  { %1103 = vsyncpa [#allocation5 + $0x1], 1 }
 0x3ba   :  { %1104 = vsyncpa [#allocation8], 1 }
 0x3bb   :  { %1105 = vsyncpa [#allocation6], 1 }
 0x3bc   :  { %1107 = vsyncpa [#allocation6 + $0x1], 1 }

</bundles_post_ra>
